<compile_context>
chip_gen: v7x
topology: tpu7x:2x2x1
jax: 0.10.0
libtpu: 0.0.40
codegen_flags: <defaults>
</compile_context>

<pallas_src>
import jax
import jax.numpy as jnp
import numpy as np
from jax.experimental import pallas as pl
from jax.experimental.pallas import tpu as pltpu


def make_positional_encoding(dim: int, max_len: int = 1271,
                             dtype=jnp.float32) -> jnp.ndarray:
    """Same math as the PyTorch __init__ (deterministic buffer)."""
    assert dim % 2 == 0, "PositionalEncoding requires an even `dim` (same as the PyTorch module)."
    position = np.arange(0, max_len, dtype=np.float32)[:, None]          # (max_len, 1)
    div_term = np.exp(np.arange(0, dim, 2, dtype=np.float32)
                      * (-np.log(10000.0) / dim))                        # (dim//2,)
    pe = np.zeros((max_len, dim), dtype=np.float32)
    pe[:, 0::2] = np.sin(position * div_term)
    pe[:, 1::2] = np.cos(position * div_term)
    return jnp.asarray(pe, dtype=dtype)                                  # stream in model dtype


def _add_pe_kernel(x_ref, pe_ref, o_ref):
    # Elementwise hot path on one (TM, dim) tile; explicit cast so any dtype
    # promotion (e.g. bf16 x vs f32 pe) is narrowed intentionally.
    o_ref[...] = (x_ref[...] + pe_ref[...]).astype(o_ref.dtype)


def _choose_block_rows(seq_len: int, dim: int, itemsize: int) -> int:
    """Sublane-aligned row-tile size, VMEM-safe on v5e/v6e/v7x."""
    mult = max(8, 32 // itemsize)                 # f32: 8, bf16: 16, int8/fp8: 32
    # Cap each tile at ~2 MiB: x + pe + out, double-buffered, stays well under
    # the 32 MiB default scoped VMEM (v7x physical VMEM is only 64 MiB).
    cap = (2 * 1024 * 1024) // max(1, dim * itemsize)
    cap = max(mult, (cap // mult) * mult)
    if seq_len >= mult:
        tm = min(512, cap, (seq_len // mult) * mult)
    else:
        tm = mult                                 # single (partial) block; Pallas masks the pad
    return tm


def positional_encoding_forward(x: jnp.ndarray, pe: jnp.ndarray, *,
                                block_rows: int | None = None) -> jnp.ndarray:
    """forward(x) = x + pe[:x.shape[0], :]  with x of shape (seq_len, dim)."""
    seq_len, dim = x.shape
    assert pe.ndim == 2 and pe.shape[1] == dim, "pe must be (max_len, dim)"
    assert seq_len <= pe.shape[0], "seq_len exceeds positional-encoding max_len"
    if pe.dtype != x.dtype:
        # One-time cast; precompute pe in the model dtype to avoid this.
        pe = pe.astype(x.dtype)

    itemsize = jnp.dtype(x.dtype).itemsize
    tm = block_rows if block_rows is not None else _choose_block_rows(seq_len, dim, itemsize)
    grid = (pl.cdiv(seq_len, tm),)

    return pl.pallas_call(
        _add_pe_kernel,
        out_shape=jax.ShapeDtypeStruct((seq_len, dim), x.dtype),
        grid=grid,
        in_specs=[
            # x: row tile i
            pl.BlockSpec((tm, dim), lambda i: (i, 0)),
            # pe: same row tile of the FULL buffer (no wrapper-side slice copy;
            # block indices line up because both are tiled from row 0).
            pl.BlockSpec((tm, dim), lambda i: (i, 0)),
        ],
        out_specs=pl.BlockSpec((tm, dim), lambda i: (i, 0)),
        compiler_params=pltpu.CompilerParams(
            dimension_semantics=("parallel",)),   # no carry -> shard across v7x's 2 TCs
    )(x, pe)


if __name__ == "__main__":
    key = jax.random.PRNGKey(0)
    k1, k2 = jax.random.split(key)

    # Primary small-shape check matching the module's forward layout (seq, dim).
    seq_len, dim = 8, 32
    x = jax.random.normal(k1, (seq_len, dim), dtype=jnp.float32)
    pe = make_positional_encoding(dim, max_len=1271, dtype=x.dtype)
    out = jax.block_until_ready(positional_encoding_forward(x, pe))
    ref = x + pe[:seq_len, :]
    np.testing.assert_allclose(np.asarray(out), np.asarray(ref), rtol=1e-6, atol=1e-6)

    # Secondary check: multi-block pipelined grid with a partial tail block.
    seq_len2, dim2 = 200, 128
    x2 = jax.random.normal(k2, (seq_len2, dim2), dtype=jnp.float32)
    pe2 = make_positional_encoding(dim2, max_len=1271, dtype=x2.dtype)
    out2 = jax.block_until_ready(positional_encoding_forward(x2, pe2, block_rows=64))
    ref2 = x2 + pe2[:seq_len2, :]
    np.testing.assert_allclose(np.asarray(out2), np.asarray(ref2), rtol=1e-6, atol=1e-6)

    print("KERNEL_OK")
</pallas_src>

<mosaic_0001>
module attributes {stable_mosaic.version = 11 : i64} {
  func.func @_add_pe_kernel(%arg0: i32, %arg1: memref<8x32xf32, #tpu.memory_space<vmem>>, %arg2: memref<8x32xf32, #tpu.memory_space<vmem>>, %arg3: memref<8x32xf32, #tpu.memory_space<vmem>>) attributes {dimension_semantics = [#tpu.dimension_semantics<parallel>], iteration_bounds = array<i64: 1>, scalar_prefetch = 0 : i64, scratch_operands = 0 : i64, tpu.core_type = #tpu.core_type<tc>, window_params = [{transform_indices = @transform_0, window_bounds = array<i64: 8, 32>}, {transform_indices = @transform_1, window_bounds = array<i64: 8, 32>}, {transform_indices = @transform_2, window_bounds = array<i64: 8, 32>}]} {
    %c0 = arith.constant 0 : index
    %c0_0 = arith.constant 0 : index
    %0 = vector.load %arg1[%c0, %c0_0] : memref<8x32xf32, #tpu.memory_space<vmem>>, vector<8x32xf32>
    %c0_1 = arith.constant 0 : index
    %c0_2 = arith.constant 0 : index
    %1 = vector.load %arg2[%c0_1, %c0_2] : memref<8x32xf32, #tpu.memory_space<vmem>>, vector<8x32xf32>
    %2 = arith.addf %0, %1 : vector<8x32xf32>
    %c0_3 = arith.constant 0 : index
    %c0_4 = arith.constant 0 : index
    %3 = vector.load %arg3[%c0_3, %c0_4] : memref<8x32xf32, #tpu.memory_space<vmem>>, vector<8x32xf32>
    tpu.vector_store %arg3[%c0_3, %c0_4], %2 {strides = array<i32>} : memref<8x32xf32, #tpu.memory_space<vmem>>, vector<8x32xf32>,
    return
  }
  func.func @transform_0(%arg0: i32) -> (i32, i32) {
    %c0_i32 = arith.constant 0 : i32
    %c0_i32_0 = arith.constant 0 : i32
    return %arg0, %c0_i32 : i32, i32
  }
  func.func @transform_1(%arg0: i32) -> (i32, i32) {
    %c0_i32 = arith.constant 0 : i32
    %c0_i32_0 = arith.constant 0 : i32
    return %arg0, %c0_i32 : i32, i32
  }
  func.func @transform_2(%arg0: i32) -> (i32, i32) {
    %c0_i32 = arith.constant 0 : i32
    %c0_i32_0 = arith.constant 0 : i32
    return %arg0, %c0_i32 : i32, i32
  }
}

</mosaic_0001>

<bundles_post_ra>
// kernel: tpu_custom_call.1
= control target key start
LH: loop header
LB: loop body
LE: loop exit
PB: predicated region body
PF: predicated region fallthrough
CT: control target
= control target key end

     0   :  { %vm15_vm0 = vcmask 261120   ;;  %s90_s0 = inlined_call_operand.vmem [shape: f32[8,32], index: 0, kind: input, shape index: {}]   ;;  %s91_s1 = inlined_call_operand.vmem [shape: f32[1271,32], index: 1, kind: input, shape index: {}]   ;;  %s92_s2 = inlined_call_operand.hbm [shape: f32[8,32], index: 2, kind: output, shape index: {}]  }
   0x1   :  { %v12_v0 = vld [vmem:[%s90_s0] sm:$0xff] }
   0x2   :  { %v13_v1 = vld [vmem:[%s91_s1] sm:$0xff] }
   0x3   :  { %7 = vsyncpa [#allocation3], 0  ;;  %v14_v2 = vadd.f32 %v13_v1, %v12_v0  ;;  %s56_s13 = smov [#allocation2]  }
   0x4   :  { %s23_s14 = sshll.u32 %s56_s13, 4  ;;  %s24_s14 = int_to_ptr.vmem [resolvable:$true] %s23_s14 }
   0x5   :  { %16 = vst.msk [vmem:[#allocation2] sm:$0xff] %vm15_vm0, %v14_v2  ;;  %s32_s15 = scalar_lea.vmem %s24_s14, 128  ;;  %p37_p1 = scmp.lt.s32.totalorder %s24_s14, %s24_s14 }
   0x6   :  { %p33_p0 = scmp.ne.s32.totalorder %s24_s14, %s32_s15  ;;  %p38_p2 = scmp.lt.s32.totalorder %s32_s15, %s32_s15 }
   0x8   :  { %p39_p3 = por %p38_p2, %p37_p1 }
   0xa   :  { %p40_p4 = pnand %p39_p3, %p33_p0 }
   0xc   :  { %43 = shalt.err (!%p40_p4)
}
   0xd   :  { %s44_s17 = scalar_lea.hbm %s92_s2, 128 }
   0xe   :  { %p45_p5 = scmp.ne.s32.totalorder %s92_s2, %s44_s17  ;;  %p48_p6 = scmp.lt.u32.totalorder %s44_s17, %s92_s2 }
  0x10   :  { %p50_p7 = pnand %p48_p6, %p45_p5 }
  0x12   :  { %53 = shalt.err (!%p50_p7)
}
  0x13   :  { %26 = dma.vmem_to_hbm [thread:$0]  %s24_s14, 128, %s92_s2, [#allocation3]  }
  0x14   :  { %54 = dma.done.wait [#allocation3], 128  }
  0x15   :  { %55 = vsyncadd [#allocation3], 4294967168 }
  0x16   :  { %30 = vsyncpa [#allocation3], 1 }

</bundles_post_ra>
